<compile_context>
chip_gen: v7x
topology: tpu7x:2x2x1
jax: 0.10.0
libtpu: 0.0.40
codegen_flags: <defaults>
</compile_context>

<pallas_src>
import functools

import numpy as np
import jax
import jax.numpy as jnp
from jax.experimental import pallas as pl
from jax.experimental.pallas import tpu as pltpu


def _rotation_cell_kernel(x_ref, h_ref, o_ref, *, c, s):
    # gate: elementwise multiply on the VPU
    g = x_ref[...] * h_ref[...]

    # Rotation fix-up for columns 0 and 1 only:
    #   out0 = c*g0 - s*g1
    #   out1 = s*g0 + c*g1
    g0 = g[:, 0:1]
    g1 = g[:, 1:2]
    r0 = c * g0 - s * g1
    r1 = s * g0 + c * g1

    # Merge the two fixed columns into the gated tile with lane-index selects,
    # then emit one full (unmasked, lane-dense) store.
    col = jax.lax.broadcasted_iota(jnp.int32, g.shape, 1)
    out = jnp.where(col == 0, r0, jnp.where(col == 1, r1, g))
    o_ref[...] = out.astype(o_ref.dtype)


def toy_rotation_cell(x, h, theta=0.1, *, block_batch=512):
    """Forward pass of ToyRotationCell: (x * h) @ W_hh^T, W_hh = rot-2x2 + identity.

    x, h: (batch, d_model).  theta: rotation (radians), a static hyperparameter.
    """
    batch, d_model = x.shape
    assert h.shape == (batch, d_model)
    assert d_model >= 2

    c = float(np.cos(theta))
    s = float(np.sin(theta))

    # Tile the batch dimension; each tile is (tm, d_model) with d_model kept
    # as the full (fast / lane) axis.  Partial trailing blocks are masked on
    # store by Pallas, and the op is purely elementwise, so ragged batch is fine.
    tm = min(block_batch, batch)
    grid = (pl.cdiv(batch, tm),)

    kernel = functools.partial(_rotation_cell_kernel, c=c, s=s)

    return pl.pallas_call(
        kernel,
        out_shape=jax.ShapeDtypeStruct((batch, d_model), x.dtype),
        grid_spec=pltpu.PrefetchScalarGridSpec(
            num_scalar_prefetch=0,
            grid=grid,
            in_specs=[
                pl.BlockSpec((tm, d_model), lambda i: (i, 0)),
                pl.BlockSpec((tm, d_model), lambda i: (i, 0)),
            ],
            out_specs=pl.BlockSpec((tm, d_model), lambda i: (i, 0)),
        ),
        compiler_params=pltpu.CompilerParams(
            dimension_semantics=("parallel",),
        ),
    )(x, h)


def make_weight_hh(d_model, theta=0.1, dtype=jnp.float32):
    """Deterministic parameter init mirroring reset_parameters() (reference only)."""
    w = np.eye(d_model, dtype=np.float32)
    cth, sth = float(np.cos(theta)), float(np.sin(theta))
    w[:2, :2] = np.array([[cth, -sth], [sth, cth]], dtype=np.float32)
    return jnp.asarray(w, dtype=dtype)


if __name__ == "__main__":
    batch, d_model = 8, 32
    theta = 0.1

    key = jax.random.PRNGKey(0)
    kx, kh = jax.random.split(key)
    x = jax.random.normal(kx, (batch, d_model), dtype=jnp.float32)
    h = jax.random.normal(kh, (batch, d_model), dtype=jnp.float32)

    out = toy_rotation_cell(x, h, theta)
    out = jax.block_until_ready(out)

    # reference in plain JAX (matches torch: h_linear(x*h) = (x*h) @ W_hh^T)
    w_hh = make_weight_hh(d_model, theta)
    ref = (x * h) @ w_hh.T
    np.testing.assert_allclose(np.asarray(out), np.asarray(ref), rtol=1e-5, atol=1e-5)

    print("KERNEL_OK")
</pallas_src>

<mosaic_0001>
module attributes {stable_mosaic.version = 11 : i64} {
  func.func @_rotation_cell_kernel(%arg0: i32, %arg1: memref<8x32xf32, #tpu.memory_space<vmem>>, %arg2: memref<8x32xf32, #tpu.memory_space<vmem>>, %arg3: memref<8x32xf32, #tpu.memory_space<vmem>>) attributes {dimension_semantics = [#tpu.dimension_semantics<parallel>], iteration_bounds = array<i64: 1>, scalar_prefetch = 0 : i64, scratch_operands = 0 : i64, tpu.core_type = #tpu.core_type<tc>, window_params = [{transform_indices = @transform_0, window_bounds = array<i64: 8, 32>}, {transform_indices = @transform_1, window_bounds = array<i64: 8, 32>}, {transform_indices = @transform_2, window_bounds = array<i64: 8, 32>}]} {
    %c0 = arith.constant 0 : index
    %c0_0 = arith.constant 0 : index
    %0 = vector.load %arg1[%c0, %c0_0] : memref<8x32xf32, #tpu.memory_space<vmem>>, vector<8x32xf32>
    %c0_1 = arith.constant 0 : index
    %c0_2 = arith.constant 0 : index
    %1 = vector.load %arg2[%c0_1, %c0_2] : memref<8x32xf32, #tpu.memory_space<vmem>>, vector<8x32xf32>
    %2 = arith.mulf %0, %1 : vector<8x32xf32>
    %3 = vector.extract_strided_slice %2 {offsets = [0, 0], sizes = [8, 1], strides = [1, 1]} : vector<8x32xf32> to vector<8x1xf32>
    %4 = vector.extract_strided_slice %2 {offsets = [0, 1], sizes = [8, 1], strides = [1, 1]} : vector<8x32xf32> to vector<8x1xf32>
    %cst = arith.constant 0.995004177 : f32
    %5 = vector.broadcast %cst : f32 to vector<8x1xf32>
    %6 = arith.mulf %5, %3 : vector<8x1xf32>
    %cst_3 = arith.constant 0.0998334139 : f32
    %7 = vector.broadcast %cst_3 : f32 to vector<8x1xf32>
    %8 = arith.mulf %7, %4 : vector<8x1xf32>
    %9 = arith.subf %6, %8 : vector<8x1xf32>
    %cst_4 = arith.constant 0.0998334139 : f32
    %10 = vector.broadcast %cst_4 : f32 to vector<8x1xf32>
    %11 = arith.mulf %10, %3 : vector<8x1xf32>
    %cst_5 = arith.constant 0.995004177 : f32
    %12 = vector.broadcast %cst_5 : f32 to vector<8x1xf32>
    %13 = arith.mulf %12, %4 : vector<8x1xf32>
    %14 = arith.addf %11, %13 : vector<8x1xf32>
    %15 = tpu.iota {dimensions = array<i32: 1>} : vector<8x32xi32>
    %c0_i32 = arith.constant 0 : i32
    %16 = vector.broadcast %c0_i32 : i32 to vector<8x32xi32>
    %17 = arith.cmpi eq, %15, %16 : vector<8x32xi32>
    %c1_i32 = arith.constant 1 : i32
    %18 = vector.broadcast %c1_i32 : i32 to vector<8x32xi32>
    %19 = arith.cmpi eq, %15, %18 : vector<8x32xi32>
    %20 = vector.shape_cast %14 : vector<8x1xf32> to vector<8x1xf32>
    %21 = vector.broadcast %20 : vector<8x1xf32> to vector<8x32xf32>
    %22 = arith.select %19, %21, %2 : vector<8x32xi1>, vector<8x32xf32>
    %23 = vector.shape_cast %9 : vector<8x1xf32> to vector<8x1xf32>
    %24 = vector.broadcast %23 : vector<8x1xf32> to vector<8x32xf32>
    %25 = arith.select %17, %24, %22 : vector<8x32xi1>, vector<8x32xf32>
    %c0_6 = arith.constant 0 : index
    %c0_7 = arith.constant 0 : index
    %26 = vector.load %arg3[%c0_6, %c0_7] : memref<8x32xf32, #tpu.memory_space<vmem>>, vector<8x32xf32>
    tpu.vector_store %arg3[%c0_6, %c0_7], %25 {strides = array<i32>} : memref<8x32xf32, #tpu.memory_space<vmem>>, vector<8x32xf32>,
    return
  }
  func.func @transform_0(%arg0: i32) -> (i32, i32) {
    %c0_i32 = arith.constant 0 : i32
    %c0_i32_0 = arith.constant 0 : i32
    return %arg0, %c0_i32 : i32, i32
  }
  func.func @transform_1(%arg0: i32) -> (i32, i32) {
    %c0_i32 = arith.constant 0 : i32
    %c0_i32_0 = arith.constant 0 : i32
    return %arg0, %c0_i32 : i32, i32
  }
  func.func @transform_2(%arg0: i32) -> (i32, i32) {
    %c0_i32 = arith.constant 0 : i32
    %c0_i32_0 = arith.constant 0 : i32
    return %arg0, %c0_i32 : i32, i32
  }
}

</mosaic_0001>

<bundles_post_ra>
// kernel: tpu_custom_call.1
= control target key start
LH: loop header
LB: loop body
LE: loop exit
PB: predicated region body
PF: predicated region fallthrough
CT: control target
= control target key end

     0   :  { %7 = vsyncpa [#allocation3], 0  ;;  %s220_s0 = inlined_call_operand.hbm [shape: f32[8,32], index: 0, kind: input, shape index: {}]   ;;  %s221_s1 = inlined_call_operand.hbm [shape: f32[8,32], index: 1, kind: input, shape index: {}]   ;;  %s222_s2 = inlined_call_operand.hbm [shape: f32[8,32], index: 2, kind: output, shape index: {}]  }
   0x1   :  { %8 = vsyncpa [#allocation6], 0 }
   0x2   :  { %9 = vsyncpa [#allocation4], 0  ;;  %s164_s9 = smov [#allocation2]   ;;  %s165_s11 = smov [#allocation5]  }
   0x3   :  { %s16_s10 = sshll.u32 %s164_s9, 4  ;;  %s26_s12 = sshll.u32 %s165_s11, 4  ;;  %s17_s10 = int_to_ptr.vmem [resolvable:$true] %s16_s10  ;;  %s27_s12 = int_to_ptr.vmem [resolvable:$true] %s26_s12 }
   0x4   :  { %s92_s15 = scalar_lea.hbm %s220_s0, 128 }
   0x5   :  { %p93_p0 = scmp.ne.s32.totalorder %s220_s0, %s92_s15  ;;  %p96_p1 = scmp.lt.u32.totalorder %s92_s15, %s220_s0 }
   0x7   :  { %p98_p2 = pnand %p96_p1, %p93_p0 }
   0x9   :  { %101 = shalt.err (!%p98_p2)
}
   0xa   :  { %s102_s20 = scalar_lea.vmem %s17_s10, 128  ;;  %p107_p4 = scmp.lt.s32.totalorder %s17_s10, %s17_s10 }
   0xb   :  { %p103_p3 = scmp.ne.s32.totalorder %s17_s10, %s102_s20  ;;  %p108_p5 = scmp.lt.s32.totalorder %s102_s20, %s102_s20 }
   0xd   :  { %p109_p6 = por %p108_p5, %p107_p4 }
   0xf   :  { %p110_p7 = pnand %p109_p6, %p103_p3 }
  0x11   :  { %113 = shalt.err (!%p110_p7)
}
  0x12   :  { %19 = dma.hbm_to_vmem [thread:$0]  %s220_s0, 128, %s17_s10, [#allocation3]  }
  0x13   :  { %s114_s25 = scalar_lea.hbm %s221_s1, 128 }
  0x14   :  { %p115_p8 = scmp.ne.s32.totalorder %s221_s1, %s114_s25  ;;  %p118_p9 = scmp.lt.u32.totalorder %s114_s25, %s221_s1 }
  0x16   :  { %p120_p10 = pnand %p118_p9, %p115_p8 }
  0x18   :  { %123 = shalt.err (!%p120_p10)
}
  0x19   :  { %s124_s30 = scalar_lea.vmem %s27_s12, 128  ;;  %p129_p12 = scmp.lt.s32.totalorder %s27_s12, %s27_s12 }
  0x1a   :  { %p125_p11 = scmp.ne.s32.totalorder %s27_s12, %s124_s30  ;;  %p130_p13 = scmp.lt.s32.totalorder %s124_s30, %s124_s30 }
  0x1c   :  { %p131_p0 = por %p130_p13, %p129_p12 }
  0x1e   :  { %p132_p1 = pnand %p131_p0, %p125_p11 }
  0x20   :  { %135 = shalt.err (!%p132_p1)
}
  0x21   :  { %29 = dma.hbm_to_vmem [thread:$0]  %s221_s1, 128, %s27_s12, [#allocation6]  }
  0x22   :  { %158 = dma.done.wait [#allocation3], 128  }
  0x23   :  { %159 = vsyncadd [#allocation3], 4294967168 }
  0x24   :  { %160 = dma.done.wait [#allocation6], 128  }
  0x25   :  { %161 = vsyncadd [#allocation6], 4294967168  ;;  %v166_v0 = vmov 0   ;;  %v36_v1 = vld [vmem:[#allocation2] sm:$0xff]  ;;  %v37_v2 = vld [vmem:[#allocation5] sm:$0xff]  ;;  %s167_s4 = smov 127   ;;  %v51_v10 = vlaneseq }
  0x26   :  { %90 = vset.pattern.permute.xlu1 %v166_v0  ;;  %91 = vset.pattern.permute.xlu0 %v166_v0  ;;  %v38_v3 = vmul.f32 %v37_v2, %v36_v1  ;;  %s168_s1 = smov [#allocation7]   ;;  %vm67_vm2 = vcmask 261120  }
  0x27   :  { %v52_v11 = vand.u32 127, %v51_v10  ;;  %s75_s5 = sshll.u32 %s168_s1, 4  ;;  %s76_s5 = int_to_ptr.vmem [resolvable:$true] %s75_s5 }
  0x28   :  { %v39_v4 = vmul.f32 0.9950042, %v38_v3  ;;  %v40_v5 = vmul.f32 0.099833414, %v38_v3  ;;  %s136_s6 = scalar_lea.vmem %s76_s5, 128  ;;  %p141_p3 = scmp.lt.s32.totalorder %s76_s5, %s76_s5 }
  0x29   :  { %vm54_vm0 = vcmp.eq.s32.totalorder %v52_v11, 1  ;;  %vm53_vm1 = vcmp.eq.s32.totalorder %v52_v11, 0  ;;  %p137_p2 = scmp.ne.s32.totalorder %s76_s5, %s136_s6  ;;  %p142_p4 = scmp.lt.s32.totalorder %s136_s6, %s136_s6 }
  0x2a   :  { %47 = vrot.lane.b32.xlu0 %v39_v4, %s167_s4 }
  0x2b   :  { %p143_p5 = por %p142_p4, %p141_p3 }
  0x2d   :  { %p144_p6 = pnand %p143_p5, %p137_p2 }
  0x2e   :  { %42 = vrot.lane.b32.xlu0 %v40_v5, %s167_s4 }
  0x9c   :  { %v48_v6 = vpop.permute.xlu0 %47 }
  0x9d   :  { %v50_v7 = vadd.f32 %v48_v6, %v40_v5 }
  0x9f   :  { %57 = vperm.xlu1 %90, %v50_v7  }
  0xa0   :  { %v43_v8 = vpop.permute.xlu0 %42 }
  0xa1   :  { %v45_v9 = vsub.f32 %v39_v4, %v43_v8 }
  0xa3   :  { %63 = vperm.xlu1 %90, %v45_v9  }
 0x11e   :  { %v58_v12 = vpop.permute.xlu1 %57 }
 0x11f   :  { %v60_v13 = vsel %vm54_vm0, %v58_v12, %v38_v3 }
 0x122   :  { %v64_v14 = vpop.permute.xlu1 %63 }
 0x123   :  { %v66_v15 = vsel %vm53_vm1, %v64_v14, %v60_v13 }
 0x124   :  { %68 = vst.msk [vmem:[#allocation7] sm:$0xff] %vm67_vm2, %v66_v15 }
 0x125   :  { %147 = shalt.err (!%p144_p6)
}
 0x126   :  { %s148_s9 = scalar_lea.hbm %s222_s2, 128 }
 0x127   :  { %p149_p7 = scmp.ne.s32.totalorder %s222_s2, %s148_s9  ;;  %p152_p8 = scmp.lt.u32.totalorder %s148_s9, %s222_s2 }
 0x129   :  { %p154_p9 = pnand %p152_p8, %p149_p7 }
 0x12b   :  { %157 = shalt.err (!%p154_p9)
}
 0x12c   :  { %78 = dma.vmem_to_hbm [thread:$0]  %s76_s5, 128, %s222_s2, [#allocation4]  }
 0x12d   :  { %162 = dma.done.wait [#allocation4], 128  }
 0x12e   :  { %163 = vsyncadd [#allocation4], 4294967168 }
 0x12f   :  { %82 = vsyncpa [#allocation3], 1 }
 0x130   :  { %83 = vsyncpa [#allocation6], 1 }
 0x131   :  { %84 = vsyncpa [#allocation4], 1 }

</bundles_post_ra>
